<compile_context>
chip_gen: v7x
topology: tpu7x:2x2x1
jax: 0.10.0
libtpu: 0.0.40
codegen_flags: <defaults>
</compile_context>

<pallas_src>
import functools

import jax
import jax.numpy as jnp
from jax.experimental import pallas as pl
from jax.experimental.pallas import tpu as pltpu

LANE = 128      # vreg lane width
SUBLANE = 8     # f32 sublane count


def _round_up(x, m):
    return ((x + m - 1) // m) * m


def dqn_kernel(x_ref, w1_ref, b1_ref, w2_ref, b2_ref, w3_ref, b3_ref, o_ref):
    # Fused 3-layer MLP: intermediates live in vregs/VMEM and never touch HBM.
    # Dots use bf16 operands with f32 accumulation (MXU-native on v5e/v6e/v7x).
    x = x_ref[...].astype(jnp.bfloat16)

    h1 = jnp.dot(x, w1_ref[...], preferred_element_type=jnp.float32) + b1_ref[...]
    h1 = jnp.maximum(h1, 0.0)

    h2 = jnp.dot(h1.astype(jnp.bfloat16), w2_ref[...],
                 preferred_element_type=jnp.float32) + b2_ref[...]
    h2 = jnp.maximum(h2, 0.0)

    out = jnp.dot(h2.astype(jnp.bfloat16), w3_ref[...],
                  preferred_element_type=jnp.float32) + b3_ref[...]
    o_ref[...] = out.astype(o_ref.dtype)


def init_dqn_params(key, input_size, hidden_size, output_size):
    """Deterministic init mimicking PyTorch nn.Linear default U[-1/sqrt(fan_in), ...].
    Weights stored as [in_features, out_features] so the kernel computes x @ W + b."""
    def linear(k, fan_in, fan_out):
        kw, kb = jax.random.split(k)
        bound = 1.0 / jnp.sqrt(jnp.float32(fan_in))
        w = jax.random.uniform(kw, (fan_in, fan_out), jnp.float32, -bound, bound)
        b = jax.random.uniform(kb, (1, fan_out), jnp.float32, -bound, bound)
        return w, b

    k1, k2, k3 = jax.random.split(key, 3)
    w1, b1 = linear(k1, input_size, hidden_size)
    w2, b2 = linear(k2, hidden_size, hidden_size)
    w3, b3 = linear(k3, hidden_size, output_size)
    return dict(w1=w1, b1=b1, w2=w2, b2=b2, w3=w3, b3=b3)


def prepare_dqn_params(params):
    """Prepare weights ONCE (not per call):
      * hidden/output feature dims zero-padded to multiples of 128 (lane-dense;
        zero padding is exact through matmul + zero bias + ReLU),
      * w1's row dim is left at input_size (no K padding of x needed),
      * weights cast to bf16 (MXU operands); biases kept f32."""
    def pad2(a, rows, cols):
        return jnp.pad(a, ((0, rows - a.shape[0]), (0, cols - a.shape[1])))

    in_s, hid = params["w1"].shape
    out_s = params["w3"].shape[1]
    hid_p = _round_up(hid, LANE)
    out_p = _round_up(out_s, LANE)
    # TODO(synk): if hidden_size is scaled up (H >= ~2048), fully resident
    # double-buffered weights no longer fit v7x's 64 MiB VMEM -- tile the hidden
    # contraction with an "arbitrary" grid axis and raise vmem_limit_bytes.
    return dict(
        w1=pad2(params["w1"], in_s, hid_p).astype(jnp.bfloat16),
        b1=pad2(params["b1"], 1, hid_p),
        w2=pad2(params["w2"], hid_p, hid_p).astype(jnp.bfloat16),
        b2=pad2(params["b2"], 1, hid_p),
        w3=pad2(params["w3"], hid_p, out_p).astype(jnp.bfloat16),
        b3=pad2(params["b3"], 1, out_p),
    )


def _choose_batch_tile(batch):
    """Static (trace-time) batch-tile choice.
    B <= 128: single grid step (latency path, e.g. action selection).
    B  > 128: aim for 2 balanced steps (multiple-of-2 grids for big B) so both
    v7x TensorCores are used; cap at 512 rows to amortize per-step overhead on
    single-TC v5e/v6e without blowing up vreg pressure."""
    if batch <= LANE:
        return _round_up(batch, SUBLANE)
    return min(512, _round_up(pl.cdiv(batch, 2), SUBLANE))


@jax.jit
def dqn_forward_padded(x, padded_params):
    """Hot path. x: [B, input_size] float. Returns the PADDED (B_pad, 128) f32
    buffer; the logical Q-values are out[:B, :output_size]. Padded rows/lanes
    hold garbage and must not be consumed."""
    p = padded_params
    B, in_s = x.shape
    hid_p = p["w1"].shape[1]
    out_p = p["w3"].shape[1]

    tb = _choose_batch_tile(B)
    b_p = _round_up(B, tb)

    x = x.astype(jnp.float32)
    if b_p != B:  # trace-time condition; skip the pad op entirely when aligned
        x = jnp.pad(x, ((0, b_p - B), (0, 0)))

    return pl.pallas_call(
        dqn_kernel,
        out_shape=jax.ShapeDtypeStruct((b_p, out_p), jnp.float32),
        grid_spec=pltpu.PrefetchScalarGridSpec(
            num_scalar_prefetch=0,
            grid=(b_p // tb,),
            in_specs=[
                pl.BlockSpec((tb, in_s), lambda i: (i, 0)),       # x: tiled over batch
                pl.BlockSpec((in_s, hid_p), lambda i: (0, 0)),    # w1 (resident, bf16)
                pl.BlockSpec((1, hid_p), lambda i: (0, 0)),       # b1 (f32)
                pl.BlockSpec((hid_p, hid_p), lambda i: (0, 0)),   # w2
                pl.BlockSpec((1, hid_p), lambda i: (0, 0)),       # b2
                pl.BlockSpec((hid_p, out_p), lambda i: (0, 0)),   # w3
                pl.BlockSpec((1, out_p), lambda i: (0, 0)),       # b3
            ],
            out_specs=pl.BlockSpec((tb, out_p), lambda i: (i, 0)),
        ),
        compiler_params=pltpu.CompilerParams(
            # Batch axis is embarrassingly parallel -> shards across v7x's 2 TCs.
            dimension_semantics=("parallel",),
        ),
    )(x, p["w1"], p["b1"], p["w2"], p["b2"], p["w3"], p["b3"])


def dqn_forward(x, padded_params, output_size):
    """Convenience wrapper: slices the padded kernel output back to [B, output_size].
    Keep this slice at the consumer / off the hot loop when possible."""
    out = dqn_forward_padded(x, padded_params)
    return out[: x.shape[0], :output_size]


def dqn_reference(x, p, cast_bf16):
    """Pure-JAX reference. cast_bf16=True mirrors the kernel's MXU math
    (bf16 operands, f32 accumulate); False is the exact PyTorch f32 semantics."""
    def cast(a):
        return a.astype(jnp.bfloat16) if cast_bf16 else a

    h1 = jnp.maximum(
        jnp.dot(cast(x), cast(p["w1"]), preferred_element_type=jnp.float32) + p["b1"], 0.0)
    h2 = jnp.maximum(
        jnp.dot(cast(h1), cast(p["w2"]), preferred_element_type=jnp.float32) + p["b2"], 0.0)
    return jnp.dot(cast(h2), cast(p["w3"]), preferred_element_type=jnp.float32) + p["b3"]


if __name__ == "__main__":
    key = jax.random.PRNGKey(0)
    kx, kp = jax.random.split(key)

    # Snake DQN: small state vector in, small action set out.
    input_size, hidden_size, output_size = 16, 32, 4
    params = init_dqn_params(kp, input_size, hidden_size, output_size)
    padded_params = prepare_dqn_params(params)

    # Batch sizes: aligned single-step, ragged (batch-pad path), and a replay
    # minibatch that exercises the 2-step "parallel" batch grid.
    for batch in (8, 13, 256):
        kx, kb = jax.random.split(kx)
        x = jax.random.normal(kb, (batch, input_size), jnp.float32)

        out = dqn_forward(x, padded_params, output_size)
        out = jax.block_until_ready(out)
        assert out.shape == (batch, output_size)

        # Tight check against the kernel's own math (bf16 operands, f32 accumulate)...
        ref_bf16 = dqn_reference(x, params, cast_bf16=True)
        assert jnp.allclose(out, ref_bf16, atol=1e-3, rtol=1e-3), f"bf16-ref mismatch at B={batch}"
        # ...and a looser check against the exact f32 PyTorch semantics.
        ref_f32 = dqn_reference(x, params, cast_bf16=False)
        assert jnp.allclose(out, ref_f32, atol=5e-2, rtol=5e-2), f"f32-ref mismatch at B={batch}"

    print("KERNEL_OK")
</pallas_src>

<mosaic_0001>
module attributes {stable_mosaic.version = 11 : i64} {
  func.func @dqn_kernel(%arg0: i32, %arg1: memref<8x16xf32, #tpu.memory_space<vmem>>, %arg2: memref<16x128xbf16, #tpu.memory_space<vmem>>, %arg3: memref<1x128xf32, #tpu.memory_space<vmem>>, %arg4: memref<128x128xbf16, #tpu.memory_space<vmem>>, %arg5: memref<1x128xf32, #tpu.memory_space<vmem>>, %arg6: memref<128x128xbf16, #tpu.memory_space<vmem>>, %arg7: memref<1x128xf32, #tpu.memory_space<vmem>>, %arg8: memref<8x128xf32, #tpu.memory_space<vmem>>) attributes {dimension_semantics = [#tpu.dimension_semantics<parallel>], iteration_bounds = array<i64: 1>, scalar_prefetch = 0 : i64, scratch_operands = 0 : i64, tpu.core_type = #tpu.core_type<tc>, window_params = [{transform_indices = @transform_0, window_bounds = array<i64: 8, 16>}, {pipeline_mode = #tpu.pipeline_mode<synchronous>, transform_indices = @transform_1, window_bounds = array<i64: 16, 128>}, {pipeline_mode = #tpu.pipeline_mode<synchronous>, transform_indices = @transform_2, window_bounds = array<i64: 1, 128>}, {pipeline_mode = #tpu.pipeline_mode<synchronous>, transform_indices = @transform_3, window_bounds = array<i64: 128, 128>}, {pipeline_mode = #tpu.pipeline_mode<synchronous>, transform_indices = @transform_4, window_bounds = array<i64: 1, 128>}, {pipeline_mode = #tpu.pipeline_mode<synchronous>, transform_indices = @transform_5, window_bounds = array<i64: 128, 128>}, {pipeline_mode = #tpu.pipeline_mode<synchronous>, transform_indices = @transform_6, window_bounds = array<i64: 1, 128>}, {transform_indices = @transform_7, window_bounds = array<i64: 8, 128>}]} {
    %c0 = arith.constant 0 : index
    %c0_0 = arith.constant 0 : index
    %0 = vector.load %arg1[%c0, %c0_0] : memref<8x16xf32, #tpu.memory_space<vmem>>, vector<8x16xf32>
    %1 = arith.truncf %0 : vector<8x16xf32> to vector<8x16xbf16>
    %c0_1 = arith.constant 0 : index
    %c0_2 = arith.constant 0 : index
    %2 = vector.load %arg2[%c0_1, %c0_2] : memref<16x128xbf16, #tpu.memory_space<vmem>>, vector<16x128xbf16>
    %cst = arith.constant dense<0.000000e+00> : vector<8x128xf32>
    %3 = tpu.matmul %1, %2, %cst {dimension_numbers = #tpu.dot_dimension_numbers<[1], [0], [0], [1], [0, 0, 1, 1], [], []>} : vector<8x16xbf16>, vector<16x128xbf16>, vector<8x128xf32> -> vector<8x128xf32>
    %c0_3 = arith.constant 0 : index
    %c0_4 = arith.constant 0 : index
    %4 = vector.load %arg3[%c0_3, %c0_4] : memref<1x128xf32, #tpu.memory_space<vmem>>, vector<1x128xf32>
    %5 = vector.broadcast %4 : vector<1x128xf32> to vector<8x128xf32>
    %6 = arith.addf %3, %5 : vector<8x128xf32>
    %cst_5 = arith.constant 0.000000e+00 : f32
    %7 = vector.broadcast %cst_5 : f32 to vector<8x128xf32>
    %8 = arith.maximumf %6, %7 : vector<8x128xf32>
    %9 = arith.truncf %8 : vector<8x128xf32> to vector<8x128xbf16>
    %c0_6 = arith.constant 0 : index
    %c0_7 = arith.constant 0 : index
    %10 = vector.load %arg4[%c0_6, %c0_7] : memref<128x128xbf16, #tpu.memory_space<vmem>>, vector<128x128xbf16>
    %cst_8 = arith.constant dense<0.000000e+00> : vector<8x128xf32>
    %11 = tpu.matmul %9, %10, %cst_8 {dimension_numbers = #tpu.dot_dimension_numbers<[1], [0], [0], [1], [0, 0, 1, 1], [], []>} : vector<8x128xbf16>, vector<128x128xbf16>, vector<8x128xf32> -> vector<8x128xf32>
    %c0_9 = arith.constant 0 : index
    %c0_10 = arith.constant 0 : index
    %12 = vector.load %arg5[%c0_9, %c0_10] : memref<1x128xf32, #tpu.memory_space<vmem>>, vector<1x128xf32>
    %13 = vector.broadcast %12 : vector<1x128xf32> to vector<8x128xf32>
    %14 = arith.addf %11, %13 : vector<8x128xf32>
    %cst_11 = arith.constant 0.000000e+00 : f32
    %15 = vector.broadcast %cst_11 : f32 to vector<8x128xf32>
    %16 = arith.maximumf %14, %15 : vector<8x128xf32>
    %17 = arith.truncf %16 : vector<8x128xf32> to vector<8x128xbf16>
    %c0_12 = arith.constant 0 : index
    %c0_13 = arith.constant 0 : index
    %18 = vector.load %arg6[%c0_12, %c0_13] : memref<128x128xbf16, #tpu.memory_space<vmem>>, vector<128x128xbf16>
    %cst_14 = arith.constant dense<0.000000e+00> : vector<8x128xf32>
    %19 = tpu.matmul %17, %18, %cst_14 {dimension_numbers = #tpu.dot_dimension_numbers<[1], [0], [0], [1], [0, 0, 1, 1], [], []>} : vector<8x128xbf16>, vector<128x128xbf16>, vector<8x128xf32> -> vector<8x128xf32>
    %c0_15 = arith.constant 0 : index
    %c0_16 = arith.constant 0 : index
    %20 = vector.load %arg7[%c0_15, %c0_16] : memref<1x128xf32, #tpu.memory_space<vmem>>, vector<1x128xf32>
    %21 = vector.broadcast %20 : vector<1x128xf32> to vector<8x128xf32>
    %22 = arith.addf %19, %21 : vector<8x128xf32>
    %c0_17 = arith.constant 0 : index
    %c0_18 = arith.constant 0 : index
    %23 = vector.load %arg8[%c0_17, %c0_18] : memref<8x128xf32, #tpu.memory_space<vmem>>, vector<8x128xf32>
    tpu.vector_store %arg8[%c0_17, %c0_18], %22 {strides = array<i32>} : memref<8x128xf32, #tpu.memory_space<vmem>>, vector<8x128xf32>,
    return
  }
  func.func @transform_0(%arg0: i32) -> (i32, i32) {
    %c0_i32 = arith.constant 0 : i32
    %c0_i32_0 = arith.constant 0 : i32
    return %arg0, %c0_i32 : i32, i32
  }
  func.func @transform_1(%arg0: i32) -> (i32, i32) {
    %c0_i32 = arith.constant 0 : i32
    %c0_i32_0 = arith.constant 0 : i32
    %c0_i32_1 = arith.constant 0 : i32
    return %c0_i32, %c0_i32_0 : i32, i32
  }
  func.func @transform_2(%arg0: i32) -> (i32, i32) {
    %c0_i32 = arith.constant 0 : i32
    %c0_i32_0 = arith.constant 0 : i32
    %c0_i32_1 = arith.constant 0 : i32
    return %c0_i32, %c0_i32_0 : i32, i32
  }
  func.func @transform_3(%arg0: i32) -> (i32, i32) {
    %c0_i32 = arith.constant 0 : i32
    %c0_i32_0 = arith.constant 0 : i32
    %c0_i32_1 = arith.constant 0 : i32
    return %c0_i32, %c0_i32_0 : i32, i32
  }
  func.func @transform_4(%arg0: i32) -> (i32, i32) {
    %c0_i32 = arith.constant 0 : i32
    %c0_i32_0 = arith.constant 0 : i32
    %c0_i32_1 = arith.constant 0 : i32
    return %c0_i32, %c0_i32_0 : i32, i32
  }
  func.func @transform_5(%arg0: i32) -> (i32, i32) {
    %c0_i32 = arith.constant 0 : i32
    %c0_i32_0 = arith.constant 0 : i32
    %c0_i32_1 = arith.constant 0 : i32
    return %c0_i32, %c0_i32_0 : i32, i32
  }
  func.func @transform_6(%arg0: i32) -> (i32, i32) {
    %c0_i32 = arith.constant 0 : i32
    %c0_i32_0 = arith.constant 0 : i32
    %c0_i32_1 = arith.constant 0 : i32
    return %c0_i32, %c0_i32_0 : i32, i32
  }
  func.func @transform_7(%arg0: i32) -> (i32, i32) {
    %c0_i32 = arith.constant 0 : i32
    %c0_i32_0 = arith.constant 0 : i32
    return %arg0, %c0_i32 : i32, i32
  }
}

</mosaic_0001>

<bundles_post_ra>
// kernel: dqn_forward_padded.1
= control target key start
LH: loop header
LB: loop body
LE: loop exit
PB: predicated region body
PF: predicated region fallthrough
CT: control target
= control target key end

     0   :  { %12 = vsyncpa [#allocation3], 0  ;;  %s711_s0 = inlined_call_operand.hbm [shape: f32[8,16], index: 0, kind: input, shape index: {}]   ;;  %s712_s1 = inlined_call_operand.vmem [shape: bf16[16,128], index: 1, kind: input, shape index: {}]   ;;  %s713_s2 = inlined_call_operand.vmem [shape: f32[1,128], index: 2, kind: input, shape index: {}]   ;;  %s714_s3 = inlined_call_operand.hbm [shape: bf16[128,128], index: 3, kind: input, shape index: {}]   ;;  %s715_s4 = inlined_call_operand.vmem [shape: f32[1,128], index: 4, kind: input, shape index: {}]   ;;  %s716_s5 = inlined_call_operand.hbm [shape: bf16[128,128], index: 5, kind: input, shape index: {}]   ;;  %s717_s6 = inlined_call_operand.vmem [shape: f32[1,128], index: 6, kind: input, shape index: {}]   ;;  %s718_s7 = inlined_call_operand.hbm [shape: f32[8,128], index: 7, kind: output, shape index: {}]  }
   0x1   :  { %13 = vsyncpa [#allocation6], 0 }
   0x2   :  { %14 = vsyncpa [#allocation4], 0  ;;  %s577_s24 = smov [#allocation5]   ;;  %s483_s28 = scalar_lea.hbm %s714_s3, 1024 }
   0x3   :  { %s34_s25 = sshll.u32 %s577_s24, 4  ;;  %p484_p0 = scmp.ne.s32.totalorder %s714_s3, %s483_s28  ;;  %s35_s25 = int_to_ptr.vmem [resolvable:$true] %s34_s25 }
   0x4   :  { %p487_p1 = scmp.lt.u32.totalorder %s483_s28, %s714_s3 }
   0x6   :  { %p489_p2 = pnand %p487_p1, %p484_p0 }
   0x8   :  { %492 = shalt.err (!%p489_p2)
}
   0x9   :  { %s493_s10 = scalar_lea.vmem %s35_s25, 1024  ;;  %p498_p4 = scmp.lt.s32.totalorder %s35_s25, %s35_s25 }
   0xa   :  { %p494_p3 = scmp.ne.s32.totalorder %s35_s25, %s493_s10  ;;  %p499_p5 = scmp.lt.s32.totalorder %s493_s10, %s493_s10 }
   0xc   :  { %p500_p6 = por %p499_p5, %p498_p4 }
   0xe   :  { %p501_p7 = pnand %p500_p6, %p494_p3 }
  0x10   :  { %504 = shalt.err (!%p501_p7)
}
  0x11   :  { %s578_s11 = smov 64   ;;  %s579_s12 = smov 4  }
  0x12   :  { %40 = dma.hbm_to_vmem [thread:$0]  %s714_s3, 1024, %s35_s25, [#allocation6], %s578_s11, %s578_s11, %s579_s12  }
  0x13   :  { %s580_s15 = smov [#allocation2]   ;;  %s581_s17 = smov [#allocation7]  }
  0x14   :  { %s21_s16 = sshll.u32 %s580_s15, 4  ;;  %s48_s18 = sshll.u32 %s581_s17, 4  ;;  %s22_s16 = int_to_ptr.vmem [resolvable:$true] %s21_s16  ;;  %s49_s18 = int_to_ptr.vmem [resolvable:$true] %s48_s18 }
  0x15   :  { %s505_s21 = scalar_lea.hbm %s711_s0, 128 }
  0x16   :  { %p506_p8 = scmp.ne.s32.totalorder %s711_s0, %s505_s21  ;;  %p509_p9 = scmp.lt.u32.totalorder %s505_s21, %s711_s0 }
  0x18   :  { %p511_p10 = pnand %p509_p9, %p506_p8 }
  0x1a   :  { %514 = shalt.err (!%p511_p10)
}
  0x1b   :  { %s515_s3 = scalar_lea.vmem %s22_s16, 128  ;;  %p520_p12 = scmp.lt.s32.totalorder %s22_s16, %s22_s16 }
  0x1c   :  { %p516_p11 = scmp.ne.s32.totalorder %s22_s16, %s515_s3  ;;  %p521_p13 = scmp.lt.s32.totalorder %s515_s3, %s515_s3 }
  0x1e   :  { %p522_p0 = por %p521_p13, %p520_p12 }
  0x20   :  { %p523_p1 = pnand %p522_p0, %p516_p11 }
  0x22   :  { %526 = shalt.err (!%p523_p1)
}
  0x23   :  { %24 = dma.hbm_to_vmem [thread:$0]  %s711_s0, 128, %s22_s16, [#allocation3]  }
  0x24   :  { %s527_s30 = scalar_lea.hbm %s716_s5, 1024 }
  0x25   :  { %p528_p2 = scmp.ne.s32.totalorder %s716_s5, %s527_s30  ;;  %p531_p3 = scmp.lt.u32.totalorder %s527_s30, %s716_s5 }
  0x27   :  { %p533_p4 = pnand %p531_p3, %p528_p2 }
  0x29   :  { %536 = shalt.err (!%p533_p4)
}
  0x2a   :  { %s537_s14 = scalar_lea.vmem %s49_s18, 1024  ;;  %p542_p6 = scmp.lt.s32.totalorder %s49_s18, %s49_s18 }
  0x2b   :  { %p538_p5 = scmp.ne.s32.totalorder %s49_s18, %s537_s14  ;;  %p543_p7 = scmp.lt.s32.totalorder %s537_s14, %s537_s14 }
  0x2d   :  { %p544_p8 = por %p543_p7, %p542_p6 }
  0x2f   :  { %p545_p9 = pnand %p544_p8, %p538_p5 }
  0x31   :  { %548 = shalt.err (!%p545_p9)
}
  0x32   :  { %54 = dma.hbm_to_vmem [thread:$0]  %s716_s5, 1024, %s49_s18, [#allocation6], %s578_s11, %s578_s11, %s579_s12  }
  0x33   :  { %571 = dma.done.wait [#allocation3], 128  }
  0x34   :  { %572 = vsyncadd [#allocation3], 4294967168 }
  0x35   :  { %573 = dma.done.wait [#allocation6], 2048  }
  0x36   :  { %574 = vsyncadd [#allocation6], 4294965248  ;;  %v582_v0 = vmov 0.0   ;;  %vm583_vm0 = vmmov 0   ;;  %v466_v1 = vld [vmem:[%s712_s1] sm:$0xff]   ;;  %vm84_vm1 = vcmask 130048  }
  0x37   :  { %412 = vmatprep.subr.bf16.mxu0 %v582_v0  ;;  %414 = vmatprep.mubr.msk.bf16.mxu0 %vm583_vm0, %v582_v0  ;;  %v67_v2 = vld [vmem:[#allocation2] sm:$0xff]  ;;  %v467_v4 = vld [vmem:[#allocation5] sm:$0xff]   ;;  %v468_v5 = vld [vmem:[#allocation5 + $0x8] sm:$0xff]   ;;  %s584_s19 = smov [#allocation8]  }
  0x38   :  { %418 = vmatprep.subr.bf16.mxu1 %v582_v0  ;;  %434 = vmatprep.mubr.msk.bf16.mxu1 %vm583_vm0, %v582_v0  ;;  %v68_v3 = vpack.c.bf16 %v67_v2, %v67_v2  ;;  %v469_v6 = vld [vmem:[#allocation5 + $0x10] sm:$0xff]   ;;  %v470_v7 = vld [vmem:[#allocation5 + $0x18] sm:$0xff]   ;;  %v471_v8 = vld [vmem:[#allocation5 + $0x20] sm:$0xff]   ;;  %s361_s20 = sshll.u32 %s584_s19, 4  ;;  %s362_s20 = int_to_ptr.vmem [resolvable:$true] %s361_s20 }
  0x39   :  { %413 = vmatpush3.bf16.msra.mxu0 %v466_v1  ;;  %419 = vmatpush3.bf16.msra.mxu1 %v467_v4  ;;  %v472_v9 = vld [vmem:[#allocation5 + $0x28] sm:$0xff]   ;;  %v473_v10 = vld [vmem:[#allocation5 + $0x30] sm:$0xff]   ;;  %v474_v11 = vld [vmem:[#allocation5 + $0x38] sm:$0xff]   ;;  %p554_p11 = scmp.lt.s32.totalorder %s362_s20, %s362_s20 }
  0x3a   :  { %438 = vmatprep.subr.bf16.mxu0 %v582_v0  ;;  %420 = vmatprep.subr.bf16.mxu1 %v582_v0  ;;  %v475_v12 = vld [vmem:[#allocation7] sm:$0xff]   ;;  %v476_v13 = vld [vmem:[#allocation7 + $0x8] sm:$0xff]   ;;  %v477_v14 = vld [vmem:[#allocation7 + $0x10] sm:$0xff]  }
  0x3b   :  { %v478_v15 = vld [vmem:[#allocation7 + $0x18] sm:$0xff]   ;;  %v479_v16 = vld [vmem:[#allocation7 + $0x20] sm:$0xff]   ;;  %v480_v17 = vld [vmem:[#allocation7 + $0x28] sm:$0xff]  }
  0x3c   :  { %415 = vmatmul.mubr.msk.bf16.vlgmr.msra.gmra.mrb[0].mxu0 %vm84_vm1, %v68_v3  ;;  %v371_v18 = vld [vmem:[%s713_s2] ss:$0 sm:$0xff]  ;;  %v481_v26 = vld [vmem:[#allocation7 + $0x30] sm:$0xff]  }
  0x3d   :  { %454 = vmatprep.mubr.msk.bf16.mxu0 %vm583_vm0, %v582_v0  ;;  %421 = vmatpush3.bf16.msra.mxu1 %v468_v5  ;;  %v482_v27 = vld [vmem:[#allocation7 + $0x38] sm:$0xff]  }
  0x3e   :  { %422 = vmatprep.subr.bf16.mxu1 %v582_v0  ;;  %439 = vmatpush3.bf16.msra.mxu0 %v475_v12  ;;  %v374_v28 = vld [vmem:[%s715_s4] ss:$0 sm:$0xff]  ;;  %s549_s4 = scalar_lea.vmem %s362_s20, 128 }
  0x3f   :  { %440 = vmatprep.subr.bf16.mxu0 %v582_v0  ;;  %v383_v36 = vld [vmem:[%s717_s6] ss:$0 sm:$0xff]  ;;  %p550_p10 = scmp.ne.s32.totalorder %s362_s20, %s549_s4  ;;  %p555_p12 = scmp.lt.s32.totalorder %s549_s4, %s549_s4 }
  0x41   :  { %423 = vmatpush3.bf16.msra.mxu1 %v469_v6  ;;  %p556_p13 = por %p555_p12, %p554_p11 }
  0x42   :  { %424 = vmatprep.subr.bf16.mxu1 %v582_v0  ;;  %441 = vmatpush3.bf16.msra.mxu0 %v476_v13 }
  0x43   :  { %442 = vmatprep.subr.bf16.mxu0 %v582_v0  ;;  %p557_p0 = pnand %p556_p13, %p550_p10 }
  0x45   :  { %425 = vmatpush3.bf16.msra.mxu1 %v470_v7 }
  0x46   :  { %426 = vmatprep.subr.bf16.mxu1 %v582_v0  ;;  %443 = vmatpush3.bf16.msra.mxu0 %v477_v14 }
  0x47   :  { %444 = vmatprep.subr.bf16.mxu0 %v582_v0 }
  0x49   :  { %427 = vmatpush3.bf16.msra.mxu1 %v471_v8 }
  0x4a   :  { %428 = vmatprep.subr.bf16.mxu1 %v582_v0  ;;  %445 = vmatpush3.bf16.msra.mxu0 %v478_v15 }
  0x4b   :  { %446 = vmatprep.subr.bf16.mxu0 %v582_v0 }
  0x4d   :  { %429 = vmatpush3.bf16.msra.mxu1 %v472_v9 }
  0x4e   :  { %430 = vmatprep.subr.bf16.mxu1 %v582_v0  ;;  %447 = vmatpush3.bf16.msra.mxu0 %v479_v16 }
  0x4f   :  { %448 = vmatprep.subr.bf16.mxu0 %v582_v0 }
  0x51   :  { %431 = vmatpush3.bf16.msra.mxu1 %v473_v10 }
  0x52   :  { %432 = vmatprep.subr.bf16.mxu1 %v582_v0  ;;  %449 = vmatpush3.bf16.msra.mxu0 %v480_v17 }
  0x53   :  { %450 = vmatprep.subr.bf16.mxu0 %v582_v0 }
  0x55   :  { %433 = vmatpush3.bf16.msra.mxu1 %v474_v11 }
  0x56   :  { %451 = vmatpush3.bf16.msra.mxu0 %v481_v26 }
  0x57   :  { %452 = vmatprep.subr.bf16.mxu0 %v582_v0 }
  0x5a   :  { %453 = vmatpush3.bf16.msra.mxu0 %v482_v27 }
 0x10f   :  { %v122_v19 = vpop.f32.mrb[0].mxu0 }
 0x110   :  { %v123_v20 = vadd.f32 %v371_v18, %v122_v19  ;;  %v416_v21 = vpop.f32.mrb[1].mxu0 }
 0x111   :  { %v125_v22 = vpop.f32.mrb[2].mxu0 }
 0x112   :  { %v128_v23 = vmax.f32 %v123_v20, 0.0  ;;  %v417_v24 = vpop.f32.mrb[3].mxu0 }
 0x114   :  { %v129_v25 = vpack.c.bf16 %v128_v23, %v128_v23 }
 0x116   :  { %435 = vmatmul.mubr.bf16.vlgmr.msra.gmra.mrb[0].mxu1 %v129_v25 }
 0x1e9   :  { %v235_v29 = vpop.f32.mrb[0].mxu1 }
 0x1ea   :  { %v236_v30 = vadd.f32 %v374_v28, %v235_v29  ;;  %v436_v31 = vpop.f32.mrb[1].mxu1 }
 0x1eb   :  { %v238_v32 = vpop.f32.mrb[2].mxu1 }
 0x1ec   :  { %v241_v33 = vmax.f32 %v236_v30, 0.0  ;;  %v437_v34 = vpop.f32.mrb[3].mxu1 }
 0x1ee   :  { %v242_v35 = vpack.c.bf16 %v241_v33, %v241_v33 }
 0x1f0   :  { %455 = vmatmul.mubr.bf16.vlgmr.msra.gmra.mrb[4].mxu0 %v242_v35 }
 0x2c3   :  { %v348_v37 = vpop.f32.mrb[4].mxu0 }
 0x2c4   :  { %v349_v38 = vadd.f32 %v383_v36, %v348_v37  ;;  %v456_v39 = vpop.f32.mrb[5].mxu0 }
 0x2c5   :  { %v351_v40 = vpop.f32.mrb[6].mxu0 }
 0x2c6   :  { %354 = vst [vmem:[#allocation8] sm:$0xff] %v349_v38  ;;  %v457_v41 = vpop.f32.mrb[7].mxu0 }
 0x2c7   :  { %560 = shalt.err (!%p557_p0)
}
 0x2c8   :  { %s561_s6 = scalar_lea.hbm %s718_s7, 128 }
 0x2c9   :  { %p562_p1 = scmp.ne.s32.totalorder %s718_s7, %s561_s6  ;;  %p565_p2 = scmp.lt.u32.totalorder %s561_s6, %s718_s7 }
 0x2cb   :  { %p567_p3 = pnand %p565_p2, %p562_p1 }
 0x2cd   :  { %570 = shalt.err (!%p567_p3)
}
 0x2ce   :  { %364 = dma.vmem_to_hbm [thread:$0]  %s362_s20, 128, %s718_s7, [#allocation4]  }
 0x2cf   :  { %575 = dma.done.wait [#allocation4], 128  }
 0x2d0   :  { %576 = vsyncadd [#allocation4], 4294967168 }
 0x2d1   :  { %368 = vsyncpa [#allocation3], 1 }
 0x2d2   :  { %369 = vsyncpa [#allocation6], 1 }
 0x2d3   :  { %370 = vsyncpa [#allocation4], 1 }

</bundles_post_ra>
